<compile_context>
chip_gen: v5e
topology: v5e:2x2
jax: 0.10.0
libtpu: 0.0.40
codegen_flags: <defaults>
</compile_context>

<pallas_src>
import jax
import jax.numpy as jnp
from jax.experimental import pallas as pl
from jax.experimental.pallas import tpu as pltpu


def _make_srcnn_kernel(W, L):
    """W: image width; L: lane extent (= B * H * W) of one grid step."""

    def kernel(p_ref, m_ref, w1_ref, b1_ref, w2_ref, b2_ref, w3_ref, b3_ref,
               o_ref):
        # p_ref : (1, 81, L)  im2col patches (9x9 taps of the 4-padded input)
        # m_ref : (25, L)     conv3 source-validity mask (f32 0/1)
        # w1_ref: (64, 81)    b1_ref: (64, 1)
        # w2_ref: (32, 64)    b2_ref: (32, 1)
        # w3_ref: (25, 32)    b3_ref: (1, 1)
        # o_ref : (1, 1, L)

        # ---- conv1 (9x9, 1->64): one MXU matmul over all 81 taps + ReLU ----
        h1 = jnp.dot(w1_ref[...], p_ref[0],
                     preferred_element_type=jnp.float32) + b1_ref[...]
        h1 = jnp.maximum(h1, 0.0)                                # (64, L)

        # ---- conv2 (1x1, 64->32): channel matmul + ReLU ----
        h2 = jnp.dot(w2_ref[...], h1,
                     preferred_element_type=jnp.float32) + b2_ref[...]
        h2 = jnp.maximum(h2, 0.0)                                # (32, L)

        # ---- conv3 (5x5, 32->1) ----
        # Channel contraction on the MXU -> one plane per spatial tap ...
        g = jnp.dot(w3_ref[...], h2,
                    preferred_element_type=jnp.float32)          # (25, L)
        # ... zero every source pixel whose shifted target would fall outside
        # its own image (replaces zero-padding; full (25, L) vregs on VPU) ...
        gm = g * m_ref[...]
        # ... then the spatial stencil is 25 lane-axis rotations (XLU) + adds
        # (VPU); everything stays 128-lane dense, no scratch, no masked vst.
        acc = jnp.zeros((1, L), jnp.float32)
        for t in range(25):
            dy, dx = divmod(t, 5)
            s = (dy - 2) * W + (dx - 2)          # flat lane shift of this tap
            row = gm[t:t + 1, :]                  # (1, L)
            if s == 0:
                acc = acc + row
            else:
                # want rolled[p] = row[(p + s) mod L]  ->  roll by (-s) mod L
                acc = acc + pltpu.roll(row, shift=(-s) % L, axis=1)
        o_ref[0] = acc + b3_ref[...]              # lane-dense (1, L) store

    return kernel


def _conv3_source_mask(H, W):
    """(25, H*W) f32 mask: entry [t, q] is 1 iff source pixel q contributes to
    an in-image output pixel for 5x5 tap t = dy*5+dx (handles zero padding and
    the row/image wrap-around introduced by flat lane-axis rolls)."""
    ys = jnp.arange(H).reshape(H, 1)
    xs = jnp.arange(W).reshape(1, W)
    rows = []
    for dy in range(5):
        for dx in range(5):
            oy = ys - (dy - 2)
            ox = xs - (dx - 2)
            m = (oy >= 0) & (oy < H) & (ox >= 0) & (ox < W)
            rows.append(m.astype(jnp.float32).reshape(H * W))
    return jnp.stack(rows, axis=0)


def srcnn_forward_pallas(x_nchw, params):
    """x_nchw: (N, 1, H, W) f32; params in PyTorch Conv2d (OIHW) layout."""
    x = x_nchw.astype(jnp.float32)
    N, Cin, H, W = x.shape
    assert Cin == 1
    HW = H * W

    # Images batched into the lane axis per grid step.
    B = max(1, min(32, (N + 1) // 2))
    G = pl.cdiv(N, B)
    Npad = G * B
    L = B * HW

    # ---- layout plumbing in plain JAX (pad / gather / reshape, no FLOPs) ----
    xp = jnp.pad(x[:, 0], ((0, 0), (4, 4), (4, 4)))
    patches = jnp.stack(
        [xp[:, dy:dy + H, dx:dx + W].reshape(N, HW)
         for dy in range(9) for dx in range(9)], axis=1)         # (N, 81, HW)
    if Npad != N:
        patches = jnp.pad(patches, ((0, Npad - N), (0, 0), (0, 0)))
    patches = patches.reshape(G, B, 81, HW).transpose(0, 2, 1, 3)
    patches = patches.reshape(G, 81, L)                          # lane = b*HW+q

    smask = jnp.tile(_conv3_source_mask(H, W), (1, B))           # (25, L)

    w1f = params["w1"].reshape(64, 81)                           # (Cout, taps)
    b1f = params["b1"].reshape(64, 1)
    w2f = params["w2"].reshape(32, 64)                           # (Cout, Cin)
    b2f = params["b2"].reshape(32, 1)
    w3f = jnp.transpose(params["w3"][0], (1, 2, 0)).reshape(25, 32)  # (taps,Cin)
    b3f = params["b3"].reshape(1, 1)

    kernel = _make_srcnn_kernel(W, L)
    out_flat = pl.pallas_call(
        kernel,
        out_shape=jax.ShapeDtypeStruct((G, 1, L), jnp.float32),
        grid_spec=pltpu.PrefetchScalarGridSpec(
            num_scalar_prefetch=0,
            grid=(G,),
            in_specs=[
                pl.BlockSpec((1, 81, L), lambda n: (n, 0, 0)),
                pl.BlockSpec((25, L), lambda n: (0, 0)),
                pl.BlockSpec((64, 81), lambda n: (0, 0)),
                pl.BlockSpec((64, 1), lambda n: (0, 0)),
                pl.BlockSpec((32, 64), lambda n: (0, 0)),
                pl.BlockSpec((32, 1), lambda n: (0, 0)),
                pl.BlockSpec((25, 32), lambda n: (0, 0)),
                pl.BlockSpec((1, 1), lambda n: (0, 0)),
            ],
            out_specs=pl.BlockSpec((1, 1, L), lambda n: (n, 0, 0)),
        ),
        compiler_params=pltpu.CompilerParams(
            dimension_semantics=("parallel",),
            vmem_limit_bytes=40 * 1024 * 1024),
    )(patches, smask, w1f, b1f, w2f, b2f, w3f, b3f)

    out = out_flat.reshape(G, 1, B, HW).transpose(0, 2, 1, 3)
    return out.reshape(Npad, 1, H, W)[:N]


srcnn_forward = jax.jit(srcnn_forward_pallas)


def init_srcnn_params(key):
    """Deterministic synthetic parameters, PyTorch Conv2d (OIHW) shapes."""
    k1, k2, k3, k4, k5, k6 = jax.random.split(key, 6)
    return {
        "w1": jax.random.normal(k1, (64, 1, 9, 9), jnp.float32) * 0.05,
        "b1": jax.random.normal(k2, (64,), jnp.float32) * 0.05,
        "w2": jax.random.normal(k3, (32, 64, 1, 1), jnp.float32) * 0.05,
        "b2": jax.random.normal(k4, (32,), jnp.float32) * 0.05,
        "w3": jax.random.normal(k5, (1, 32, 5, 5), jnp.float32) * 0.05,
        "b3": jax.random.normal(k6, (1,), jnp.float32) * 0.05,
    }


def _reference_forward(x_nchw, params):
    """Pure-JAX reference (lax.conv, NCHW/OIHW like PyTorch)."""

    def conv(x, w, b, pad):
        y = jax.lax.conv_general_dilated(
            x, w, window_strides=(1, 1), padding=[(pad, pad), (pad, pad)],
            dimension_numbers=("NCHW", "OIHW", "NCHW"))
        return y + b[None, :, None, None]

    h = jax.nn.relu(conv(x_nchw, params["w1"], params["b1"], 4))
    h = jax.nn.relu(conv(h, params["w2"], params["b2"], 0))
    return conv(h, params["w3"], params["b3"], 2)


if __name__ == "__main__":
    key = jax.random.PRNGKey(0)
    kp, kx = jax.random.split(key)
    params = init_srcnn_params(kp)

    # SRCNN takes single-channel images: (N=2, C=1, H=16, W=16), NCHW.
    x = jax.random.normal(kx, (2, 1, 16, 16), jnp.float32)

    out = jax.block_until_ready(srcnn_forward(x, params))
    ref = jax.block_until_ready(_reference_forward(x, params))

    assert out.shape == (2, 1, 16, 16), out.shape
    assert jnp.allclose(out, ref, atol=1e-4, rtol=1e-4), "mismatch vs JAX reference"

    print("KERNEL_OK")
</pallas_src>

<mosaic_0001>
module attributes {stable_mosaic.version = 11 : i64} {
  func.func @kernel(%arg0: i32, %arg1: memref<1x81x256xf32, #tpu.memory_space<vmem>>, %arg2: memref<25x256xf32, #tpu.memory_space<vmem>>, %arg3: memref<64x81xf32, #tpu.memory_space<vmem>>, %arg4: memref<64x1xf32, #tpu.memory_space<vmem>>, %arg5: memref<32x64xf32, #tpu.memory_space<vmem>>, %arg6: memref<32x1xf32, #tpu.memory_space<vmem>>, %arg7: memref<25x32xf32, #tpu.memory_space<vmem>>, %arg8: memref<1x1xf32, #tpu.memory_space<vmem>>, %arg9: memref<1x1x256xf32, #tpu.memory_space<vmem>>) attributes {dimension_semantics = [#tpu.dimension_semantics<parallel>], iteration_bounds = array<i64: 2>, scalar_prefetch = 0 : i64, scratch_operands = 0 : i64, tpu.core_type = #tpu.core_type<tc>, window_params = [{transform_indices = @transform_0, window_bounds = array<i64: 1, 81, 256>}, {pipeline_mode = #tpu.pipeline_mode<synchronous>, transform_indices = @transform_1, window_bounds = array<i64: 25, 256>}, {pipeline_mode = #tpu.pipeline_mode<synchronous>, transform_indices = @transform_2, window_bounds = array<i64: 64, 81>}, {pipeline_mode = #tpu.pipeline_mode<synchronous>, transform_indices = @transform_3, window_bounds = array<i64: 64, 1>}, {pipeline_mode = #tpu.pipeline_mode<synchronous>, transform_indices = @transform_4, window_bounds = array<i64: 32, 64>}, {pipeline_mode = #tpu.pipeline_mode<synchronous>, transform_indices = @transform_5, window_bounds = array<i64: 32, 1>}, {pipeline_mode = #tpu.pipeline_mode<synchronous>, transform_indices = @transform_6, window_bounds = array<i64: 25, 32>}, {pipeline_mode = #tpu.pipeline_mode<synchronous>, transform_indices = @transform_7, window_bounds = array<i64: 1, 1>}, {transform_indices = @transform_8, window_bounds = array<i64: 1, 1, 256>}]} {
    %c0 = arith.constant 0 : index
    %c0_0 = arith.constant 0 : index
    %0 = vector.load %arg3[%c0, %c0_0] : memref<64x81xf32, #tpu.memory_space<vmem>>, vector<64x81xf32>
    %c0_1 = arith.constant 0 : index
    %c0_2 = arith.constant 0 : index
    %c0_3 = arith.constant 0 : index
    %1 = vector.load %arg1[%c0_1, %c0_2, %c0_3] : memref<1x81x256xf32, #tpu.memory_space<vmem>>, vector<1x81x256xf32>
    %2 = vector.shape_cast %1 : vector<1x81x256xf32> to vector<81x256xf32>
    %cst = arith.constant dense<0.000000e+00> : vector<64x256xf32>
    %3 = tpu.matmul %0, %2, %cst {dimension_numbers = #tpu.dot_dimension_numbers<[1], [0], [0], [1], [0, 0, 1, 1], [], []>} : vector<64x81xf32>, vector<81x256xf32>, vector<64x256xf32> -> vector<64x256xf32>
    %c0_4 = arith.constant 0 : index
    %c0_5 = arith.constant 0 : index
    %4 = vector.load %arg4[%c0_4, %c0_5] : memref<64x1xf32, #tpu.memory_space<vmem>>, vector<64x1xf32>
    %5 = vector.broadcast %4 : vector<64x1xf32> to vector<64x256xf32>
    %6 = arith.addf %3, %5 : vector<64x256xf32>
    %cst_6 = arith.constant 0.000000e+00 : f32
    %7 = vector.broadcast %cst_6 : f32 to vector<64x256xf32>
    %8 = arith.maximumf %6, %7 : vector<64x256xf32>
    %c0_7 = arith.constant 0 : index
    %c0_8 = arith.constant 0 : index
    %9 = vector.load %arg5[%c0_7, %c0_8] : memref<32x64xf32, #tpu.memory_space<vmem>>, vector<32x64xf32>
    %cst_9 = arith.constant dense<0.000000e+00> : vector<32x256xf32>
    %10 = tpu.matmul %9, %8, %cst_9 {dimension_numbers = #tpu.dot_dimension_numbers<[1], [0], [0], [1], [0, 0, 1, 1], [], []>} : vector<32x64xf32>, vector<64x256xf32>, vector<32x256xf32> -> vector<32x256xf32>
    %c0_10 = arith.constant 0 : index
    %c0_11 = arith.constant 0 : index
    %11 = vector.load %arg6[%c0_10, %c0_11] : memref<32x1xf32, #tpu.memory_space<vmem>>, vector<32x1xf32>
    %12 = vector.broadcast %11 : vector<32x1xf32> to vector<32x256xf32>
    %13 = arith.addf %10, %12 : vector<32x256xf32>
    %cst_12 = arith.constant 0.000000e+00 : f32
    %14 = vector.broadcast %cst_12 : f32 to vector<32x256xf32>
    %15 = arith.maximumf %13, %14 : vector<32x256xf32>
    %c0_13 = arith.constant 0 : index
    %c0_14 = arith.constant 0 : index
    %16 = vector.load %arg7[%c0_13, %c0_14] : memref<25x32xf32, #tpu.memory_space<vmem>>, vector<25x32xf32>
    %cst_15 = arith.constant dense<0.000000e+00> : vector<25x256xf32>
    %17 = tpu.matmul %16, %15, %cst_15 {dimension_numbers = #tpu.dot_dimension_numbers<[1], [0], [0], [1], [0, 0, 1, 1], [], []>} : vector<25x32xf32>, vector<32x256xf32>, vector<25x256xf32> -> vector<25x256xf32>
    %c0_16 = arith.constant 0 : index
    %c0_17 = arith.constant 0 : index
    %18 = vector.load %arg2[%c0_16, %c0_17] : memref<25x256xf32, #tpu.memory_space<vmem>>, vector<25x256xf32>
    %19 = arith.mulf %17, %18 : vector<25x256xf32>
    %cst_18 = arith.constant 0.000000e+00 : f32
    %20 = vector.broadcast %cst_18 : f32 to vector<1x256xf32>
    %21 = vector.extract_strided_slice %19 {offsets = [0, 0], sizes = [1, 256], strides = [1, 1]} : vector<25x256xf32> to vector<1x256xf32>
    %c34_i32 = arith.constant 34 : i32
    %22 = tpu.dynamic_rotate %21 by %c34_i32 dim 1 : vector<1x256xf32>, i32 -> vector<1x256xf32>
    %23 = arith.addf %20, %22 : vector<1x256xf32>
    %24 = vector.extract_strided_slice %19 {offsets = [1, 0], sizes = [1, 256], strides = [1, 1]} : vector<25x256xf32> to vector<1x256xf32>
    %c33_i32 = arith.constant 33 : i32
    %25 = tpu.dynamic_rotate %24 by %c33_i32 dim 1 : vector<1x256xf32>, i32 -> vector<1x256xf32>
    %26 = arith.addf %23, %25 : vector<1x256xf32>
    %27 = vector.extract_strided_slice %19 {offsets = [2, 0], sizes = [1, 256], strides = [1, 1]} : vector<25x256xf32> to vector<1x256xf32>
    %c32_i32 = arith.constant 32 : i32
    %28 = tpu.dynamic_rotate %27 by %c32_i32 dim 1 : vector<1x256xf32>, i32 -> vector<1x256xf32>
    %29 = arith.addf %26, %28 : vector<1x256xf32>
    %30 = vector.extract_strided_slice %19 {offsets = [3, 0], sizes = [1, 256], strides = [1, 1]} : vector<25x256xf32> to vector<1x256xf32>
    %c31_i32 = arith.constant 31 : i32
    %31 = tpu.dynamic_rotate %30 by %c31_i32 dim 1 : vector<1x256xf32>, i32 -> vector<1x256xf32>
    %32 = arith.addf %29, %31 : vector<1x256xf32>
    %33 = vector.extract_strided_slice %19 {offsets = [4, 0], sizes = [1, 256], strides = [1, 1]} : vector<25x256xf32> to vector<1x256xf32>
    %c30_i32 = arith.constant 30 : i32
    %34 = tpu.dynamic_rotate %33 by %c30_i32 dim 1 : vector<1x256xf32>, i32 -> vector<1x256xf32>
    %35 = arith.addf %32, %34 : vector<1x256xf32>
    %36 = vector.extract_strided_slice %19 {offsets = [5, 0], sizes = [1, 256], strides = [1, 1]} : vector<25x256xf32> to vector<1x256xf32>
    %c18_i32 = arith.constant 18 : i32
    %37 = tpu.dynamic_rotate %36 by %c18_i32 dim 1 : vector<1x256xf32>, i32 -> vector<1x256xf32>
    %38 = arith.addf %35, %37 : vector<1x256xf32>
    %39 = vector.extract_strided_slice %19 {offsets = [6, 0], sizes = [1, 256], strides = [1, 1]} : vector<25x256xf32> to vector<1x256xf32>
    %c17_i32 = arith.constant 17 : i32
    %40 = tpu.dynamic_rotate %39 by %c17_i32 dim 1 : vector<1x256xf32>, i32 -> vector<1x256xf32>
    %41 = arith.addf %38, %40 : vector<1x256xf32>
    %42 = vector.extract_strided_slice %19 {offsets = [7, 0], sizes = [1, 256], strides = [1, 1]} : vector<25x256xf32> to vector<1x256xf32>
    %c16_i32 = arith.constant 16 : i32
    %43 = tpu.dynamic_rotate %42 by %c16_i32 dim 1 : vector<1x256xf32>, i32 -> vector<1x256xf32>
    %44 = arith.addf %41, %43 : vector<1x256xf32>
    %45 = vector.extract_strided_slice %19 {offsets = [8, 0], sizes = [1, 256], strides = [1, 1]} : vector<25x256xf32> to vector<1x256xf32>
    %c15_i32 = arith.constant 15 : i32
    %46 = tpu.dynamic_rotate %45 by %c15_i32 dim 1 : vector<1x256xf32>, i32 -> vector<1x256xf32>
    %47 = arith.addf %44, %46 : vector<1x256xf32>
    %48 = vector.extract_strided_slice %19 {offsets = [9, 0], sizes = [1, 256], strides = [1, 1]} : vector<25x256xf32> to vector<1x256xf32>
    %c14_i32 = arith.constant 14 : i32
    %49 = tpu.dynamic_rotate %48 by %c14_i32 dim 1 : vector<1x256xf32>, i32 -> vector<1x256xf32>
    %50 = arith.addf %47, %49 : vector<1x256xf32>
    %51 = vector.extract_strided_slice %19 {offsets = [10, 0], sizes = [1, 256], strides = [1, 1]} : vector<25x256xf32> to vector<1x256xf32>
    %c2_i32 = arith.constant 2 : i32
    %52 = tpu.dynamic_rotate %51 by %c2_i32 dim 1 : vector<1x256xf32>, i32 -> vector<1x256xf32>
    %53 = arith.addf %50, %52 : vector<1x256xf32>
    %54 = vector.extract_strided_slice %19 {offsets = [11, 0], sizes = [1, 256], strides = [1, 1]} : vector<25x256xf32> to vector<1x256xf32>
    %c1_i32 = arith.constant 1 : i32
    %55 = tpu.dynamic_rotate %54 by %c1_i32 dim 1 : vector<1x256xf32>, i32 -> vector<1x256xf32>
    %56 = arith.addf %53, %55 : vector<1x256xf32>
    %57 = vector.extract_strided_slice %19 {offsets = [12, 0], sizes = [1, 256], strides = [1, 1]} : vector<25x256xf32> to vector<1x256xf32>
    %58 = arith.addf %56, %57 : vector<1x256xf32>
    %59 = vector.extract_strided_slice %19 {offsets = [13, 0], sizes = [1, 256], strides = [1, 1]} : vector<25x256xf32> to vector<1x256xf32>
    %c255_i32 = arith.constant 255 : i32
    %60 = tpu.dynamic_rotate %59 by %c255_i32 dim 1 : vector<1x256xf32>, i32 -> vector<1x256xf32>
    %61 = arith.addf %58, %60 : vector<1x256xf32>
    %62 = vector.extract_strided_slice %19 {offsets = [14, 0], sizes = [1, 256], strides = [1, 1]} : vector<25x256xf32> to vector<1x256xf32>
    %c254_i32 = arith.constant 254 : i32
    %63 = tpu.dynamic_rotate %62 by %c254_i32 dim 1 : vector<1x256xf32>, i32 -> vector<1x256xf32>
    %64 = arith.addf %61, %63 : vector<1x256xf32>
    %65 = vector.extract_strided_slice %19 {offsets = [15, 0], sizes = [1, 256], strides = [1, 1]} : vector<25x256xf32> to vector<1x256xf32>
    %c242_i32 = arith.constant 242 : i32
    %66 = tpu.dynamic_rotate %65 by %c242_i32 dim 1 : vector<1x256xf32>, i32 -> vector<1x256xf32>
    %67 = arith.addf %64, %66 : vector<1x256xf32>
    %68 = vector.extract_strided_slice %19 {offsets = [16, 0], sizes = [1, 256], strides = [1, 1]} : vector<25x256xf32> to vector<1x256xf32>
    %c241_i32 = arith.constant 241 : i32
    %69 = tpu.dynamic_rotate %68 by %c241_i32 dim 1 : vector<1x256xf32>, i32 -> vector<1x256xf32>
    %70 = arith.addf %67, %69 : vector<1x256xf32>
    %71 = vector.extract_strided_slice %19 {offsets = [17, 0], sizes = [1, 256], strides = [1, 1]} : vector<25x256xf32> to vector<1x256xf32>
    %c240_i32 = arith.constant 240 : i32
    %72 = tpu.dynamic_rotate %71 by %c240_i32 dim 1 : vector<1x256xf32>, i32 -> vector<1x256xf32>
    %73 = arith.addf %70, %72 : vector<1x256xf32>
    %74 = vector.extract_strided_slice %19 {offsets = [18, 0], sizes = [1, 256], strides = [1, 1]} : vector<25x256xf32> to vector<1x256xf32>
    %c239_i32 = arith.constant 239 : i32
    %75 = tpu.dynamic_rotate %74 by %c239_i32 dim 1 : vector<1x256xf32>, i32 -> vector<1x256xf32>
    %76 = arith.addf %73, %75 : vector<1x256xf32>
    %77 = vector.extract_strided_slice %19 {offsets = [19, 0], sizes = [1, 256], strides = [1, 1]} : vector<25x256xf32> to vector<1x256xf32>
    %c238_i32 = arith.constant 238 : i32
    %78 = tpu.dynamic_rotate %77 by %c238_i32 dim 1 : vector<1x256xf32>, i32 -> vector<1x256xf32>
    %79 = arith.addf %76, %78 : vector<1x256xf32>
    %80 = vector.extract_strided_slice %19 {offsets = [20, 0], sizes = [1, 256], strides = [1, 1]} : vector<25x256xf32> to vector<1x256xf32>
    %c226_i32 = arith.constant 226 : i32
    %81 = tpu.dynamic_rotate %80 by %c226_i32 dim 1 : vector<1x256xf32>, i32 -> vector<1x256xf32>
    %82 = arith.addf %79, %81 : vector<1x256xf32>
    %83 = vector.extract_strided_slice %19 {offsets = [21, 0], sizes = [1, 256], strides = [1, 1]} : vector<25x256xf32> to vector<1x256xf32>
    %c225_i32 = arith.constant 225 : i32
    %84 = tpu.dynamic_rotate %83 by %c225_i32 dim 1 : vector<1x256xf32>, i32 -> vector<1x256xf32>
    %85 = arith.addf %82, %84 : vector<1x256xf32>
    %86 = vector.extract_strided_slice %19 {offsets = [22, 0], sizes = [1, 256], strides = [1, 1]} : vector<25x256xf32> to vector<1x256xf32>
    %c224_i32 = arith.constant 224 : i32
    %87 = tpu.dynamic_rotate %86 by %c224_i32 dim 1 : vector<1x256xf32>, i32 -> vector<1x256xf32>
    %88 = arith.addf %85, %87 : vector<1x256xf32>
    %89 = vector.extract_strided_slice %19 {offsets = [23, 0], sizes = [1, 256], strides = [1, 1]} : vector<25x256xf32> to vector<1x256xf32>
    %c223_i32 = arith.constant 223 : i32
    %90 = tpu.dynamic_rotate %89 by %c223_i32 dim 1 : vector<1x256xf32>, i32 -> vector<1x256xf32>
    %91 = arith.addf %88, %90 : vector<1x256xf32>
    %92 = vector.extract_strided_slice %19 {offsets = [24, 0], sizes = [1, 256], strides = [1, 1]} : vector<25x256xf32> to vector<1x256xf32>
    %c222_i32 = arith.constant 222 : i32
    %93 = tpu.dynamic_rotate %92 by %c222_i32 dim 1 : vector<1x256xf32>, i32 -> vector<1x256xf32>
    %94 = arith.addf %91, %93 : vector<1x256xf32>
    %c0_19 = arith.constant 0 : index
    %c0_20 = arith.constant 0 : index
    %95 = vector.load %arg8[%c0_19, %c0_20] : memref<1x1xf32, #tpu.memory_space<vmem>>, vector<1x1xf32>
    %96 = vector.broadcast %95 : vector<1x1xf32> to vector<1x256xf32>
    %97 = arith.addf %94, %96 : vector<1x256xf32>
    %c0_21 = arith.constant 0 : index
    %c0_22 = arith.constant 0 : index
    %c0_23 = arith.constant 0 : index
    %98 = vector.load %arg9[%c0_21, %c0_22, %c0_23] : memref<1x1x256xf32, #tpu.memory_space<vmem>>, vector<1x1x256xf32>
    %99 = vector.shape_cast %98 : vector<1x1x256xf32> to vector<1x256xf32>
    %100 = vector.shape_cast %97 : vector<1x256xf32> to vector<1x1x256xf32>
    tpu.vector_store %arg9[%c0_21, %c0_22, %c0_23], %100 {strides = array<i32>} : memref<1x1x256xf32, #tpu.memory_space<vmem>>, vector<1x1x256xf32>,
    return
  }
  func.func @transform_0(%arg0: i32) -> (i32, i32, i32) {
    %c0_i32 = arith.constant 0 : i32
    %c0_i32_0 = arith.constant 0 : i32
    %c0_i32_1 = arith.constant 0 : i32
    return %arg0, %c0_i32, %c0_i32_0 : i32, i32, i32
  }
  func.func @transform_1(%arg0: i32) -> (i32, i32) {
    %c0_i32 = arith.constant 0 : i32
    %c0_i32_0 = arith.constant 0 : i32
    %c0_i32_1 = arith.constant 0 : i32
    return %c0_i32, %c0_i32_0 : i32, i32
  }
  func.func @transform_2(%arg0: i32) -> (i32, i32) {
    %c0_i32 = arith.constant 0 : i32
    %c0_i32_0 = arith.constant 0 : i32
    %c0_i32_1 = arith.constant 0 : i32
    return %c0_i32, %c0_i32_0 : i32, i32
  }
  func.func @transform_3(%arg0: i32) -> (i32, i32) {
    %c0_i32 = arith.constant 0 : i32
    %c0_i32_0 = arith.constant 0 : i32
    %c0_i32_1 = arith.constant 0 : i32
    return %c0_i32, %c0_i32_0 : i32, i32
  }
  func.func @transform_4(%arg0: i32) -> (i32, i32) {
    %c0_i32 = arith.constant 0 : i32
    %c0_i32_0 = arith.constant 0 : i32
    %c0_i32_1 = arith.constant 0 : i32
    return %c0_i32, %c0_i32_0 : i32, i32
  }
  func.func @transform_5(%arg0: i32) -> (i32, i32) {
    %c0_i32 = arith.constant 0 : i32
    %c0_i32_0 = arith.constant 0 : i32
    %c0_i32_1 = arith.constant 0 : i32
    return %c0_i32, %c0_i32_0 : i32, i32
  }
  func.func @transform_6(%arg0: i32) -> (i32, i32) {
    %c0_i32 = arith.constant 0 : i32
    %c0_i32_0 = arith.constant 0 : i32
    %c0_i32_1 = arith.constant 0 : i32
    return %c0_i32, %c0_i32_0 : i32, i32
  }
  func.func @transform_7(%arg0: i32) -> (i32, i32) {
    %c0_i32 = arith.constant 0 : i32
    %c0_i32_0 = arith.constant 0 : i32
    %c0_i32_1 = arith.constant 0 : i32
    return %c0_i32, %c0_i32_0 : i32, i32
  }
  func.func @transform_8(%arg0: i32) -> (i32, i32, i32) {
    %c0_i32 = arith.constant 0 : i32
    %c0_i32_0 = arith.constant 0 : i32
    %c0_i32_1 = arith.constant 0 : i32
    return %arg0, %c0_i32, %c0_i32_0 : i32, i32, i32
  }
}

</mosaic_0001>

<bundles_post_ra>
// kernel: srcnn_forward_pallas.1
= control target key start
LH: loop header
LB: loop body
LE: loop exit
PB: predicated region body
PF: predicated region fallthrough
CT: control target
= control target key end

     0   :  { %s1255_s29 = smov 0   ;;  %s1475_s0 = inlined_call_operand.vmem [shape: f32[2,81,256], index: 0, kind: input, shape index: {}]   ;;  %s1476_s1 = inlined_call_operand.vmem [shape: f32[25,256], index: 1, kind: input, shape index: {}]   ;;  %s1477_s2 = inlined_call_operand.vmem [shape: f32[64,81], index: 2, kind: input, shape index: {}]   ;;  %s1478_s3 = inlined_call_operand.vmem [shape: f32[64,1], index: 3, kind: input, shape index: {}]   ;;  %s1479_s4 = inlined_call_operand.vmem [shape: f32[32,64], index: 4, kind: input, shape index: {}]   ;;  %s1480_s5 = inlined_call_operand.vmem [shape: f32[32,1], index: 5, kind: input, shape index: {}]   ;;  %s1481_s6 = inlined_call_operand.vmem [shape: f32[25,32], index: 6, kind: input, shape index: {}]   ;;  %s1482_s7 = inlined_call_operand.<no memory space> [shape: f32[1,1], index: 7, kind: input, shape index: {}]   ;;  %s1483_s8 = inlined_call_operand.vmem [shape: f32[2,1,256], index: 8, kind: output, shape index: {}]  }
   0x1   :  { %v13_v0 = vstv %s1482_s7 }
   0x2   :  { %14 = vst [vmem:[#allocation2] sm:$0x1] %v13_v0 }
   0x3 LB: > { %s1094_s30 = sadd.s32 4294967295, %s1180_s29   ;;  %p1098_p0 = scmp.ge.s32.totalorder %s1180_s29, 1  ;;  %s1180_s29 = sphi %s1255_s29, %s20_s29  }
   0x4   : > { %p264_p1 = scmp.lt.s32.totalorder %s1180_s29, 3 }
   0x6   : > { %p265_p2 = pnand %p1098_p0, %p264_p1 }
   0x7   : > { %p297_p3 = scmp.lt.s32.totalorder (!%p265_p2), %s1094_s30, 1  ;;  %s1183_s10 = smov (!%p265_p2), 34  }
   0x8   : > { %268 = sbr.rel (%p265_p2) target bundleno = 792 (0x318), region = 52  ;;  %s1184_s7 = smov (!%p265_p2), 33  }
   0x9   : > { %s1185_s11 = smov (!%p265_p2), 32   ;;  %s1187_s13 = smov (!%p265_p2), 30  }
   0xa   : > { %s1188_s14 = smov (!%p265_p2), 18   ;;  %s1190_s18 = smov (!%p265_p2), 16  }
   0xb   : > { %s1191_s21 = smov (!%p265_p2), 15   ;;  %s1192_s22 = smov (!%p265_p2), 14  }
   0xc   : > { %s1193_s23 = smov (!%p265_p2), 2   ;;  %s1194_s24 = smov (!%p265_p2), 1  }
   0xd   : > { %v341_v1 = vld [vmem:[%s1478_s3 + $0x28] sm:$0xff]  ;;  %v1182_v2 = vmov 0   ;;  %v343_v3 = vld [vmem:[%s1478_s3 + $0x38] sm:$0xff]  ;;  %s1485_s30 = smov (!%p297_p3, %s1094_s30), 1  ;;  %vm409_vm0 = vcmask 1040384   ;;  %v340_v8 = vld [vmem:[%s1478_s3 + $0x20] sm:$0xff] }
   0xe   : > { %1172 = vset.pattern.permute.xlu1 %v1182_v2  ;;  %1171 = vset.pattern.permute.xlu0 %v1182_v2  ;;  %s1137_s12 = smul.u32 176, %s1485_s30  ;;  %v342_v9 = vld [vmem:[%s1478_s3 + $0x30] sm:$0xff]  ;;  %v336_v18 = vld [vmem:[%s1478_s3] sm:$0xff]  ;;  %v337_v19 = vld [vmem:[%s1478_s3 + $0x8] sm:$0xff]  ;;  %vm384_vm1 = vcmask 662528   ;;  %vm542_vm2 = vcmask 523264  }
   0xf   : > { %371 = vperm.xlu1 %1172, %v341_v1   ;;  %381 = vperm.xlu0 %1171, %v343_v3   ;;  %v306_v30 = vld [vmem:[%s1477_s2] sm:$0xff]  ;;  %v307_v31 = vld [vmem:[%s1477_s2 + $0x8] sm:$0xff]  ;;  %v339_v32 = vld [vmem:[%s1478_s3 + $0x18] sm:$0xff]  ;;  %vm625_vm3 = vcmask 261120   ;;  %s1195_s25 = smov 127   ;;  %s1196_s26 = smov 126  }
  0x10   : > { %1173 = vset.pattern.permute.xlu2 %v1182_v2  ;;  %s1275_s15 = scalar_lea.vmem %s1475_s0, %s1137_s12  ;;  %v308_v33 = vld [vmem:[%s1477_s2 + $0x10] sm:$0xff]  ;;  %v309_v35 = vld [vmem:[%s1477_s2 + $0x18] sm:$0xff]  ;;  %v519_v37 = vld [vmem:[%s1480_s5 + $0x8] sm:$0xff]  ;;  %s1186_s12 = smov 31  }
  0x11   : > { %v334_v4 = vld [vmem:[%s1275_s15 + $0xa0] sm:$0x1]  ;;  %v335_v5 = vld [vmem:[%s1275_s15 + $0xa8] sm:$0x1]  ;;  %v332_v6 = vld [vmem:[%s1275_s15 + $0x90] sm:$0xff]  ;;  %361 = vperm.xlu2 %1173, %v339_v32   ;;  %s1197_s9 = smov 114  }
  0x12   : > { %1101 = vmatpush.msk.msra.mxu0 %vm409_vm0, %v334_v4  ;;  %1110 = vmatpush.msk.msra.mxu1 %vm409_vm0, %v335_v5  ;;  %v333_v7 = vld [vmem:[%s1275_s15 + $0x98] sm:$0xff]  ;;  %v330_v10 = vld [vmem:[%s1275_s15 + $0x80] sm:$0xff]  ;;  %v331_v11 = vld [vmem:[%s1275_s15 + $0x88] sm:$0xff]  ;;  %s1203_s16 = smov 97   ;;  %s1204_s17 = smov 96  }
  0x13   : > { %v328_v12 = vld [vmem:[%s1275_s15 + $0x70] sm:$0xff]  ;;  %v329_v13 = vld [vmem:[%s1275_s15 + $0x78] sm:$0xff]  ;;  %v326_v14 = vld [vmem:[%s1275_s15 + $0x60] sm:$0xff]  ;;  %s1205_s20 = smov 95  }
  0x14   : > { %422 = vmatpush.msra.mxu0 %v332_v6  ;;  %463 = vmatpush.msra.mxu1 %v333_v7  ;;  %v327_v15 = vld [vmem:[%s1275_s15 + $0x68] sm:$0xff]  ;;  %v324_v16 = vld [vmem:[%s1275_s15 + $0x50] sm:$0xff]  ;;  %v325_v17 = vld [vmem:[%s1275_s15 + $0x58] sm:$0xff] }
  0x15   : > { %v322_v20 = vld [vmem:[%s1275_s15 + $0x40] sm:$0xff]  ;;  %v323_v21 = vld [vmem:[%s1275_s15 + $0x48] sm:$0xff]  ;;  %v320_v22 = vld [vmem:[%s1275_s15 + $0x30] sm:$0xff] }
  0x16   : > { %423 = vmatpush.msra.mxu0 %v330_v10  ;;  %464 = vmatpush.msra.mxu1 %v331_v11  ;;  %v321_v23 = vld [vmem:[%s1275_s15 + $0x38] sm:$0xff]  ;;  %v318_v24 = vld [vmem:[%s1275_s15 + $0x20] sm:$0xff]  ;;  %v319_v25 = vld [vmem:[%s1275_s15 + $0x28] sm:$0xff] }
  0x17   : > { %366 = vperm.xlu1 %1172, %v340_v8   ;;  %376 = vperm.xlu0 %1171, %v342_v9   ;;  %v316_v26 = vld [vmem:[%s1275_s15 + $0x10] sm:$0xff]  ;;  %v317_v27 = vld [vmem:[%s1275_s15 + $0x18] sm:$0xff]  ;;  %v314_v28 = vld [vmem:[%s1275_s15] sm:$0xff] }
  0x18   : > { %424 = vmatpush.msra.mxu0 %v328_v12  ;;  %465 = vmatpush.msra.mxu1 %v329_v13  ;;  %v315_v29 = vld [vmem:[%s1275_s15 + $0x8] sm:$0xff]  ;;  %v338_v34 = vld [vmem:[%s1478_s3 + $0x10] sm:$0xff]  ;;  %v521_v38 = vld [vmem:[%s1480_s5 + $0x18] sm:$0xff]  ;;  %s1189_s15 = smov 17  }
  0x19   : > { %356 = vperm.xlu2 %1173, %v338_v34   ;;  %v520_v36 = vld [vmem:[%s1480_s5 + $0x10] sm:$0xff]  ;;  %v310_v39 = vld [vmem:[%s1477_s2 + $0x20] sm:$0xff]  ;;  %v311_v41 = vld [vmem:[%s1477_s2 + $0x28] sm:$0xff] }
  0x1a   : > { %425 = vmatpush.msra.mxu0 %v326_v14  ;;  %466 = vmatpush.msra.mxu1 %v327_v15  ;;  %v518_v40 = vld [vmem:[%s1480_s5] sm:$0xff]  ;;  %v312_v42 = vld [vmem:[%s1477_s2 + $0x30] sm:$0xff]  ;;  %v313_v43 = vld [vmem:[%s1477_s2 + $0x38] sm:$0xff] }
  0x1c   : > { %426 = vmatpush.msra.mxu0 %v324_v16  ;;  %467 = vmatpush.msra.mxu1 %v325_v17 }
  0x1e   : > { %427 = vmatpush.msra.mxu0 %v322_v20  ;;  %468 = vmatpush.msra.mxu1 %v323_v21 }
  0x1f   : > { %346 = vperm.xlu1 %1172, %v336_v18   ;;  %351 = vperm.xlu0 %1171, %v337_v19  }
  0x20   : > { %428 = vmatpush.msra.mxu0 %v320_v22  ;;  %469 = vmatpush.msra.mxu1 %v321_v23 }
  0x21   : > { %539 = vperm.xlu2 %1173, %v521_v38   ;;  %v516_v38 = vld [vmem:[%s1479_s4 + $0x10] sm:$0xff] }
  0x22   : > { %429 = vmatpush.msra.mxu0 %v318_v24  ;;  %470 = vmatpush.msra.mxu1 %v319_v25 }
  0x24   : > { %430 = vmatpush.msra.mxu0 %v316_v26  ;;  %471 = vmatpush.msra.mxu1 %v317_v27 }
  0x26   : > { %431 = vmatpush.msra.mxu0 %v314_v28  ;;  %472 = vmatpush.msra.mxu1 %v315_v29 }
  0x27   : > { %1102 = vmatmul.msk.f32.vlgmr.msra.gmra.mxu0 %vm384_vm1, %v306_v30  ;;  %1111 = vmatmul.msk.f32.vlgmr.msra.gmra.mxu1 %vm384_vm1, %v306_v30 }
  0x28   : > { %534 = vperm.xlu0 %1171, %v520_v36   ;;  %529 = vperm.xlu1 %1172, %v519_v37   ;;  %v514_v36 = vld [vmem:[%s1479_s4] sm:$0xff]  ;;  %v515_v37 = vld [vmem:[%s1479_s4 + $0x8] sm:$0xff] }
  0x29   : > { %524 = vperm.xlu2 %1173, %v518_v40  }
  0x2f   : > { %1103 = vmatmul.msk.f32.gmra.mxu0 %vm384_vm1, %v307_v31  ;;  %1112 = vmatmul.msk.f32.gmra.mxu1 %vm384_vm1, %v307_v31 }
  0x37   : > { %1104 = vmatmul.msk.f32.gmra.mxu0 %vm384_vm1, %v308_v33  ;;  %1113 = vmatmul.msk.f32.gmra.mxu1 %vm384_vm1, %v308_v33 }
  0x3f   : > { %1105 = vmatmul.msk.f32.gmra.mxu0 %vm384_vm1, %v309_v35  ;;  %1114 = vmatmul.msk.f32.gmra.mxu1 %vm384_vm1, %v309_v35 }
  0x47   : > { %1106 = vmatmul.msk.f32.gmra.mxu0 %vm384_vm1, %v310_v39  ;;  %1115 = vmatmul.msk.f32.gmra.mxu1 %vm384_vm1, %v310_v39  ;;  %v517_v39 = vld [vmem:[%s1479_s4 + $0x18] sm:$0xff] }
  0x4f   : > { %1107 = vmatmul.msk.f32.gmra.mxu0 %vm384_vm1, %v311_v41  ;;  %1116 = vmatmul.msk.f32.gmra.mxu1 %vm384_vm1, %v311_v41 }
  0x57   : > { %1108 = vmatmul.msk.f32.gmra.mxu0 %vm384_vm1, %v312_v42  ;;  %1117 = vmatmul.msk.f32.gmra.mxu1 %vm384_vm1, %v312_v42 }
  0x5f   : > { %1109 = vmatmul.msk.f32.gmra.mxu0 %vm384_vm1, %v313_v43  ;;  %1118 = vmatmul.msk.f32.gmra.mxu1 %vm384_vm1, %v313_v43 }
  0x6b   : > { %v362_v60 = vpop.permute.xlu2 %361 }
  0x73   : > { %v357_v13 = vpop.permute.xlu2 %356 }
  0x81   : > { %v382_v56 = vpop.permute.xlu0 %381  ;;  %v372_v57 = vpop.permute.xlu1 %371 }
  0x89   : > { %v377_v61 = vpop.permute.xlu0 %376  ;;  %v367_v62 = vpop.permute.xlu1 %366 }
  0x91   : > { %v352_v18 = vpop.permute.xlu0 %351  ;;  %v347_v23 = vpop.permute.xlu1 %346 }
  0xa4   : > { %v433_v44 = vpop.f32.mrf.mxu0  ;;  %v474_v45 = vpop.f32.mrf.mxu1 }
  0xa5   : > { %v434_v28 = vadd.f32 %v433_v44, %v347_v23  ;;  %v475_v29 = vadd.f32 %v474_v45, %v347_v23 }
  0xa7   : > { %v498_v34 = vmax.f32 %v434_v28, 0.0  ;;  %v499_v35 = vmax.f32 %v475_v29, 0.0  ;;  %v698_v28 = vld [vmem:[%s1476_s1 + $0x10] sm:$0xff] }
  0xac   : > { %v436_v46 = vpop.f32.mrf.mxu0  ;;  %v477_v47 = vpop.f32.mrf.mxu1 }
  0xad   : > { %v437_v24 = vadd.f32 %v436_v46, %v352_v18  ;;  %v478_v25 = vadd.f32 %v477_v47, %v352_v18  ;;  %v540_v46 = vpop.permute.xlu2 %539  ;;  %v535_v47 = vpop.permute.xlu0 %534 }
  0xaf   : > { %v500_v32 = vmax.f32 %v437_v24, 0.0  ;;  %v501_v33 = vmax.f32 %v478_v25, 0.0 }
  0xb4   : > { %v439_v48 = vpop.f32.mrf.mxu0  ;;  %v480_v49 = vpop.f32.mrf.mxu1 }
  0xb5   : > { %v440_v19 = vadd.f32 %v439_v48, %v357_v13  ;;  %v481_v20 = vadd.f32 %v480_v49, %v357_v13 }
  0xb7   : > { %v502_v30 = vmax.f32 %v440_v19, 0.0  ;;  %v503_v31 = vmax.f32 %v481_v20, 0.0 }
  0xbc   : > { %v442_v50 = vpop.f32.mrf.mxu0  ;;  %v483_v51 = vpop.f32.mrf.mxu1 }
  0xbd   : > { %v443_v14 = vadd.f32 %v442_v50, %v362_v60  ;;  %v484_v15 = vadd.f32 %v483_v51, %v362_v60 }
  0xbf   : > { %v504_v26 = vmax.f32 %v443_v14, 0.0  ;;  %v505_v27 = vmax.f32 %v484_v15, 0.0 }
  0xc4   : > { %v445_v52 = vpop.f32.mrf.mxu0  ;;  %v486_v53 = vpop.f32.mrf.mxu1 }
  0xc5   : > { %v446_v9 = vadd.f32 %v445_v52, %v367_v62  ;;  %v487_v10 = vadd.f32 %v486_v53, %v367_v62 }
  0xc7   : > { %v506_v21 = vmax.f32 %v446_v9, 0.0  ;;  %v507_v22 = vmax.f32 %v487_v10, 0.0  ;;  %v697_v9 = vld [vmem:[%s1476_s1 + $0x8] sm:$0xff] }
  0xcc   : > { %v448_v54 = vpop.f32.mrf.mxu0  ;;  %v489_v55 = vpop.f32.mrf.mxu1 }
  0xcd   : > { %v449_v5 = vadd.f32 %v448_v54, %v372_v57  ;;  %v490_v6 = vadd.f32 %v489_v55, %v372_v57  ;;  %v530_v54 = vpop.permute.xlu1 %529 }
  0xcf   : > { %v508_v16 = vmax.f32 %v449_v5, 0.0  ;;  %v509_v17 = vmax.f32 %v490_v6, 0.0  ;;  %v622_v5 = vld [vmem:[%s1481_s6 + $0x8] sm:$0xff]  ;;  %v623_v6 = vld [vmem:[%s1481_s6 + $0x10] sm:$0xff] }
  0xd4   : > { %v451_v58 = vpop.f32.mrf.mxu0  ;;  %v492_v59 = vpop.f32.mrf.mxu1 }
  0xd5   : > { %v452_v1 = vadd.f32 %v451_v58, %v377_v61  ;;  %v493_v2 = vadd.f32 %v492_v59, %v377_v61  ;;  %v525_v59 = vpop.permute.xlu2 %524 }
  0xd7   : > { %v510_v11 = vmax.f32 %v452_v1, 0.0  ;;  %v511_v12 = vmax.f32 %v493_v2, 0.0 }
  0xdc   : > { %v454_v63 = vpop.f32.mrf.mxu0  ;;  %v495_v0 = vpop.f32.mrf.mxu1 }
  0xdd   : > { %v455_v3 = vadd.f32 %v454_v63, %v382_v56  ;;  %v496_v4 = vadd.f32 %v495_v0, %v382_v56 }
  0xdf   : > { %v512_v7 = vmax.f32 %v455_v3, 0.0  ;;  %v513_v8 = vmax.f32 %v496_v4, 0.0  ;;  %v621_v4 = vld [vmem:[%s1481_s6] sm:$0xff] }
  0xe1   : > { %563 = vmatpush.msra.mxu2 %v512_v7  ;;  %592 = vmatpush.msra.mxu3 %v513_v8  ;;  %v624_v7 = vld [vmem:[%s1481_s6 + $0x18] sm:$0x1]  ;;  %v696_v8 = vld [vmem:[%s1476_s1] sm:$0xff] }
  0xe3   : > { %564 = vmatpush.msra.mxu2 %v510_v11  ;;  %593 = vmatpush.msra.mxu3 %v511_v12 }
  0xe5   : > { %565 = vmatpush.msra.mxu2 %v508_v16  ;;  %594 = vmatpush.msra.mxu3 %v509_v17 }
  0xe7   : > { %566 = vmatpush.msra.mxu2 %v506_v21  ;;  %595 = vmatpush.msra.mxu3 %v507_v22 }
  0xe9   : > { %567 = vmatpush.msra.mxu2 %v504_v26  ;;  %596 = vmatpush.msra.mxu3 %v505_v27 }
  0xeb   : > { %568 = vmatpush.msra.mxu2 %v502_v30  ;;  %597 = vmatpush.msra.mxu3 %v503_v31  ;;  %v699_v30 = vld [vmem:[%s1476_s1 + $0x18] sm:$0xff] }
  0xed   : > { %569 = vmatpush.msra.mxu2 %v500_v32  ;;  %598 = vmatpush.msra.mxu3 %v501_v33 }
  0xef   : > { %570 = vmatpush.msra.mxu2 %v498_v34  ;;  %599 = vmatpush.msra.mxu3 %v499_v35 }
  0xf0   : > { %1119 = vmatmul.msk.f32.vlgmr.msra.gmra.mxu2 %vm542_vm2, %v514_v36  ;;  %1123 = vmatmul.msk.f32.vlgmr.msra.gmra.mxu3 %vm542_vm2, %v514_v36 }
  0xf8   : > { %1120 = vmatmul.msk.f32.gmra.mxu2 %vm542_vm2, %v515_v37  ;;  %1124 = vmatmul.msk.f32.gmra.mxu3 %vm542_vm2, %v515_v37 }
 0x100   : > { %1121 = vmatmul.msk.f32.gmra.mxu2 %vm542_vm2, %v516_v38  ;;  %1125 = vmatmul.msk.f32.gmra.mxu3 %vm542_vm2, %v516_v38 }
 0x108   : > { %1122 = vmatmul.msk.f32.gmra.mxu2 %vm542_vm2, %v517_v39  ;;  %1126 = vmatmul.msk.f32.gmra.mxu3 %vm542_vm2, %v517_v39 }
 0x173   : > { %v572_v40 = vpop.f32.mrf.mxu2  ;;  %v601_v41 = vpop.f32.mrf.mxu3 }
 0x174   : > { %v573_v60 = vadd.f32 %v572_v40, %v525_v59  ;;  %v602_v61 = vadd.f32 %v601_v41, %v525_v59 }
 0x176   : > { %v613_v2 = vmax.f32 %v573_v60, 0.0  ;;  %v614_v3 = vmax.f32 %v602_v61, 0.0 }
 0x17b   : > { %v575_v42 = vpop.f32.mrf.mxu2  ;;  %v604_v43 = vpop.f32.mrf.mxu3 }
 0x17c   : > { %v576_v55 = vadd.f32 %v575_v42, %v530_v54  ;;  %v605_v56 = vadd.f32 %v604_v43, %v530_v54 }
 0x17e   : > { %v615_v0 = vmax.f32 %v576_v55, 0.0  ;;  %v616_v1 = vmax.f32 %v605_v56, 0.0 }
 0x183   : > { %v578_v44 = vpop.f32.mrf.mxu2  ;;  %v607_v45 = vpop.f32.mrf.mxu3 }
 0x184   : > { %v579_v50 = vadd.f32 %v578_v44, %v535_v47  ;;  %v608_v51 = vadd.f32 %v607_v45, %v535_v47 }
 0x186   : > { %v617_v62 = vmax.f32 %v579_v50, 0.0  ;;  %v618_v63 = vmax.f32 %v608_v51, 0.0 }
 0x18b   : > { %v581_v48 = vpop.f32.mrf.mxu2  ;;  %v610_v49 = vpop.f32.mrf.mxu3 }
 0x18c   : > { %v582_v52 = vadd.f32 %v581_v48, %v540_v46  ;;  %v611_v53 = vadd.f32 %v610_v49, %v540_v46  ;;  %v700_v46 = vld [vmem:[%s1476_s1 + $0x20] sm:$0xff]  ;;  %v701_v49 = vld [vmem:[%s1476_s1 + $0x28] sm:$0xff] }
 0x18e   : > { %v619_v57 = vmax.f32 %v582_v52, 0.0  ;;  %v620_v58 = vmax.f32 %v611_v53, 0.0 }
 0x190   : > { %650 = vmatpush.msrb.mxu2 %v619_v57  ;;  %679 = vmatpush.msrb.mxu3 %v620_v58 }
 0x192   : > { %651 = vmatpush.msrb.mxu2 %v617_v62  ;;  %680 = vmatpush.msrb.mxu3 %v618_v63 }
 0x194   : > { %652 = vmatpush.msrb.mxu2 %v615_v0  ;;  %681 = vmatpush.msrb.mxu3 %v616_v1  ;;  %v716_v0 = vlaneseq }
 0x196   : > { %653 = vmatpush.msrb.mxu2 %v613_v2  ;;  %682 = vmatpush.msrb.mxu3 %v614_v3  ;;  %v1432_v1 = vand.u32 127, %v716_v0 }
 0x197   : > { %1127 = vmatmul.msk.f32.vlgmr.msrb.gmra.mxu2 %vm625_vm3, %v621_v4  ;;  %1131 = vmatmul.msk.f32.vlgmr.msrb.gmra.mxu3 %vm625_vm3, %v621_v4 }
 0x198   : > { %vm718_vm4 = vcmp.lt.s32.totalorder %v1432_v1, 34  ;;  %vm733_vm5 = vcmp.lt.s32.totalorder %v1432_v1, 33  ;;  %vm746_vm6 = vcmp.lt.s32.totalorder %v1432_v1, 32  ;;  %vm759_vm7 = vcmp.lt.s32.totalorder %v1432_v1, 31 }
 0x199   : > { %vm772_vm8 = vcmp.lt.s32.totalorder %v1432_v1, 30  ;;  %vm785_vm9 = vcmp.lt.s32.totalorder %v1432_v1, 18  ;;  %vm798_vm10 = vcmp.lt.s32.totalorder %v1432_v1, 17  ;;  %vm811_vm11 = vcmp.lt.s32.totalorder %v1432_v1, 16 }
 0x19a   : > { %vm820_vm12 = vcmp.lt.s32.totalorder %v1432_v1, 15  ;;  %vm835_vm13 = vcmp.lt.s32.totalorder %v1432_v1, 14  ;;  %vm848_vm14 = vcmp.lt.s32.totalorder %v1432_v1, 2  ;;  %vm861_vm15 = vcmp.lt.s32.totalorder %v1432_v1, 1 }
 0x19b   : > { %vm880_vm1 = vcmp.lt.s32.totalorder %v1432_v1, 127  ;;  %vm893_vm2 = vcmp.lt.s32.totalorder %v1432_v1, 126 }
 0x19f   : > { %1128 = vmatmul.msk.f32.gmra.mxu2 %vm625_vm3, %v622_v5  ;;  %1132 = vmatmul.msk.f32.gmra.mxu3 %vm625_vm3, %v622_v5 }
 0x1a7   : > { %1129 = vmatmul.msk.f32.gmra.mxu2 %vm625_vm3, %v623_v6  ;;  %1133 = vmatmul.msk.f32.gmra.mxu3 %vm625_vm3, %v623_v6 }
 0x1af   : > { %1130 = vmatmul.msk.f32.gmra.mxu2 %vm625_vm3, %v624_v7  ;;  %1134 = vmatmul.msk.f32.gmra.mxu3 %vm625_vm3, %v624_v7  ;;  %v702_v7 = vld [vmem:[%s1476_s1 + $0x30] sm:$0x1]  ;;  %vm906_vm3 = vcmp.lt.s32.totalorder %v1432_v1, 114 }
 0x21a   : > { %v655_v10 = vpop.f32.mrf.mxu2  ;;  %v684_v11 = vpop.f32.mrf.mxu3 }
 0x21b   : > { %v704_v12 = vmul.f32 %v696_v8, %v655_v10  ;;  %v705_v13 = vmul.f32 %v697_v9, %v684_v11 }
 0x21d   : > { %714 = vrot.lane.b32.xlu1 %v705_v13, %s1183_s10  ;;  %712 = vrot.lane.b32.xlu0 %v704_v12, %s1183_s10  ;;  %v725_v14 = vrot.slane %v704_v12, 1  ;;  %v726_v15 = vrot.slane %v705_v13, 1  ;;  %v738_v16 = vrot.slane %v704_v12, 2  ;;  %v739_v17 = vrot.slane %v705_v13, 2 }
 0x21e   : > { %v751_v18 = vrot.slane %v704_v12, 3  ;;  %v752_v19 = vrot.slane %v705_v13, 3  ;;  %v764_v20 = vrot.slane %v704_v12, 4  ;;  %v765_v21 = vrot.slane %v705_v13, 4 }
 0x21f   : > { %729 = vrot.lane.b32.xlu2 %v725_v14, %s1184_s7  ;;  %v777_v22 = vrot.slane %v704_v12, 5  ;;  %v778_v23 = vrot.slane %v705_v13, 5  ;;  %v790_v24 = vrot.slane %v704_v12, 6  ;;  %v791_v25 = vrot.slane %v705_v13, 6 }
 0x220   : > { %v803_v26 = vrot.slane %v704_v12, 7  ;;  %v804_v33 = vrot.slane %v705_v13, 7  ;;  %v703_v13 = vld [vmem:[%s1476_s1 + $0x38] sm:$0x1] }
 0x222   : > { %v658_v27 = vpop.f32.mrf.mxu2  ;;  %v687_v29 = vpop.f32.mrf.mxu3 }
 0x223   : > { %v1407_v31 = vmul.f32 %v698_v28, %v658_v27  ;;  %v1409_v32 = vmul.f32 %v699_v30, %v687_v29 }
 0x225   : > { %731 = vrot.lane.b32.xlu0 %v726_v15, %s1184_s7  ;;  %742 = vrot.lane.b32.xlu1 %v738_v16, %s1185_s11  ;;  %v828_v34 = vrot.slane %v1409_v32, 1  ;;  %v827_v35 = vrot.slane %v1407_v31, 1  ;;  %v840_v36 = vrot.slane %v1407_v31, 2  ;;  %v841_v37 = vrot.slane %v1409_v32, 2 }
 0x226   : > { %v853_v38 = vrot.slane %v1407_v31, 3  ;;  %v854_v39 = vrot.slane %v1409_v32, 3  ;;  %v873_v40 = vrot.slane %v1409_v32, 5  ;;  %v872_v41 = vrot.slane %v1407_v31, 5 }
 0x227   : > { %744 = vrot.lane.b32.xlu2 %v739_v17, %s1185_s11  ;;  %v885_v42 = vrot.slane %v1407_v31, 6  ;;  %v898_v43 = vrot.slane %v1407_v31, 7  ;;  %v886_v44 = vrot.slane %v1409_v32, 6  ;;  %v899_v47 = vrot.slane %v1409_v32, 7  ;;  %s1198_s11 = smov 113  }
 0x22a   : > { %v661_v45 = vpop.f32.mrf.mxu2  ;;  %v690_v48 = vpop.f32.mrf.mxu3 }
 0x22b   : > { %v708_v50 = vmul.f32 %v700_v46, %v661_v45  ;;  %v709_v51 = vmul.f32 %v701_v49, %v690_v48 }
 0x22d   : > { %755 = vrot.lane.b32.xlu0 %v751_v18, %s1186_s12  ;;  %757 = vrot.lane.b32.xlu1 %v752_v19, %s1186_s12  ;;  %v922_v52 = vrot.slane %v708_v50, 1  ;;  %s1199_s12 = smov 112   ;;  %v923_v53 = vrot.slane %v709_v51, 1  ;;  %v935_v54 = vrot.slane %v708_v50, 2  ;;  %v936_v55 = vrot.slane %v709_v51, 2 }
 0x22e   : > { %v948_v57 = vrot.slane %v708_v50, 3  ;;  %v949_v58 = vrot.slane %v709_v51, 3  ;;  %v961_v59 = vrot.slane %v708_v50, 4  ;;  %v962_v61 = vrot.slane %v709_v51, 4 }
 0x22f   : > { %768 = vrot.lane.b32.xlu2 %v764_v20, %s1187_s13  ;;  %v974_v62 = vrot.slane %v708_v50, 5  ;;  %v975_v63 = vrot.slane %v709_v51, 5  ;;  %v987_v3 = vrot.slane %v708_v50, 6  ;;  %v988_v4 = vrot.slane %v709_v51, 6 }
 0x230   : > { %v1000_v5 = vrot.slane %v708_v50, 7  ;;  %v1001_v15 = vrot.slane %v709_v51, 7 }
 0x232   : > { %v664_v6 = vpop.f32.mrf.mxu2  ;;  %v693_v12 = vpop.f32.mrf.mxu3 }
 0x233   : > { %v710_v14 = vmul.f32 %v702_v7, %v664_v6  ;;  %v711_v16 = vmul.f32 %v703_v13, %v693_v12 }
 0x235   : > { %770 = vrot.lane.b32.xlu0 %v765_v21, %s1187_s13  ;;  %781 = vrot.lane.b32.xlu1 %v777_v22, %s1188_s14  ;;  %s1200_s13 = smov 111  }
 0x237   : > { %783 = vrot.lane.b32.xlu2 %v778_v23, %s1188_s14  ;;  %s1201_s14 = smov 110  }
 0x23d   : > { %794 = vrot.lane.b32.xlu0 %v790_v24, %s1189_s15  ;;  %796 = vrot.lane.b32.xlu1 %v791_v25, %s1189_s15  ;;  %s1202_s15 = smov 98  }
 0x23f   : > { %807 = vrot.lane.b32.xlu2 %v803_v26, %s1190_s18  ;;  %v1022_v26 = vld [vmem:[#allocation2] sm:$0x1] }
 0x245   : > { %809 = vrot.lane.b32.xlu0 %v804_v33, %s1190_s18  ;;  %816 = vrot.lane.b32.xlu1 %v1407_v31, %s1191_s21 }
 0x247   : > { %818 = vrot.lane.b32.xlu2 %v1409_v32, %s1191_s21 }
 0x24d   : > { %833 = vrot.lane.b32.xlu1 %v828_v34, %s1192_s22  ;;  %831 = vrot.lane.b32.xlu0 %v827_v35, %s1192_s22 }
 0x24f   : > { %844 = vrot.lane.b32.xlu2 %v840_v36, %s1193_s23 }
 0x255   : > { %857 = vrot.lane.b32.xlu1 %v853_v38, %s1194_s24  ;;  %846 = vrot.lane.b32.xlu0 %v841_v37, %s1193_s23  ;;  %s1206_s23 = smov 94  }
 0x257   : > { %859 = vrot.lane.b32.xlu2 %v854_v39, %s1194_s24  ;;  %s1100_s24 = sshll.u32 %s1485_s30, 1 }
 0x258   : > { %s305_s27 = scalar_lea.vmem %s1483_s8, %s1100_s24 }
 0x25d   : > { %878 = vrot.lane.b32.xlu1 %v873_v40, %s1195_s25  ;;  %876 = vrot.lane.b32.xlu0 %v872_v41, %s1195_s25 }
 0x25f   : > { %889 = vrot.lane.b32.xlu2 %v885_v42, %s1196_s26 }
 0x265   : > { %902 = vrot.lane.b32.xlu1 %v898_v43, %s1197_s9  ;;  %891 = vrot.lane.b32.xlu0 %v886_v44, %s1196_s26 }
 0x267   : > { %904 = vrot.lane.b32.xlu2 %v899_v47, %s1197_s9 }
 0x26d   : > { %913 = vrot.lane.b32.xlu1 %v709_v51, %s1198_s11  ;;  %911 = vrot.lane.b32.xlu0 %v708_v50, %s1198_s11 }
 0x26f   : > { %926 = vrot.lane.b32.xlu2 %v922_v52, %s1199_s12 }
 0x275   : > { %928 = vrot.lane.b32.xlu0 %v923_v53, %s1199_s12  ;;  %939 = vrot.lane.b32.xlu1 %v935_v54, %s1200_s13 }
 0x277   : > { %941 = vrot.lane.b32.xlu2 %v936_v55, %s1200_s13 }
 0x279   : > { %v730_v56 = vpop.permute.xlu2 %729 }
 0x27d   : > { %952 = vrot.lane.b32.xlu0 %v948_v57, %s1201_s14  ;;  %954 = vrot.lane.b32.xlu1 %v949_v58, %s1201_s14 }
 0x27f   : > { %965 = vrot.lane.b32.xlu2 %v961_v59, %s1202_s15 }
 0x281   : > { %v745_v60 = vpop.permute.xlu2 %744 }
 0x285   : > { %967 = vrot.lane.b32.xlu0 %v962_v61, %s1202_s15  ;;  %978 = vrot.lane.b32.xlu1 %v974_v62, %s1203_s16 }
 0x287   : > { %980 = vrot.lane.b32.xlu2 %v975_v63, %s1203_s16 }
 0x289   : > { %v769_v2 = vpop.permute.xlu2 %768 }
 0x28d   : > { %991 = vrot.lane.b32.xlu0 %v987_v3, %s1204_s17  ;;  %993 = vrot.lane.b32.xlu1 %v988_v4, %s1204_s17 }
 0x28f   : > { %v715_v8 = vpop.permute.xlu1 %714  ;;  %v713_v9 = vpop.permute.xlu0 %712  ;;  %1004 = vrot.lane.b32.xlu2 %v1000_v5, %s1205_s20 }
 0x290   : > { %v719_v10 = vsel %vm718_vm4, %v713_v9, %v715_v8  ;;  %v720_v11 = vsel %vm718_vm4, %v715_v8, %v713_v9  ;;  %vm915_vm4 = vcmp.lt.s32.totalorder %v1432_v1, 113 }
 0x291   : > { %v784_v17 = vpop.permute.xlu2 %783 }
 0x295   : > { %1006 = vrot.lane.b32.xlu0 %v1001_v15, %s1205_s20  ;;  %1013 = vrot.lane.b32.xlu1 %v710_v14, %s1206_s23 }
 0x297   : > { %v732_v18 = vpop.permute.xlu0 %731  ;;  %v743_v19 = vpop.permute.xlu1 %742  ;;  %1015 = vrot.lane.b32.xlu2 %v711_v16, %s1206_s23 }
 0x298   : > { %v734_v20 = vsel %vm733_vm5, %v730_v56, %v732_v18  ;;  %v735_v21 = vsel %vm733_vm5, %v732_v18, %v730_v56  ;;  %v747_v22 = vsel %vm746_vm6, %v743_v19, %v745_v60  ;;  %v748_v23 = vsel %vm746_vm6, %v745_v60, %v743_v19 }
 0x299   : > { %v736_v24 = vadd.f32 %v735_v21, %v720_v11  ;;  %v737_v25 = vadd.f32 %v734_v20, %v719_v10  ;;  %v808_v29 = vpop.permute.xlu2 %807  ;;  %vm930_vm5 = vcmp.lt.s32.totalorder %v1432_v1, 112  ;;  %vm943_vm6 = vcmp.lt.s32.totalorder %v1432_v1, 111 }
 0x29b   : > { %v749_v27 = vadd.f32 %v748_v23, %v736_v24  ;;  %v750_v28 = vadd.f32 %v747_v22, %v737_v25  ;;  %v866_v22 = vrot.slane %v1407_v31, 4  ;;  %v867_v23 = vrot.slane %v1409_v32, 4 }
 0x29d   : > { %1025 = vperm.xlu0 %1171, %v1022_v26  }
 0x29f   : > { %v756_v30 = vpop.permute.xlu0 %755  ;;  %v758_v33 = vpop.permute.xlu1 %757 }
 0x2a0   : > { %v760_v34 = vsel %vm759_vm7, %v756_v30, %v758_v33  ;;  %v761_v35 = vsel %vm759_vm7, %v758_v33, %v756_v30  ;;  %vm956_vm7 = vcmp.lt.s32.totalorder %v1432_v1, 110 }
 0x2a1   : > { %v762_v36 = vadd.f32 %v761_v35, %v749_v27  ;;  %v763_v37 = vadd.f32 %v760_v34, %v750_v28  ;;  %v819_v40 = vpop.permute.xlu2 %818 }
 0x2a7   : > { %v771_v38 = vpop.permute.xlu0 %770  ;;  %v782_v39 = vpop.permute.xlu1 %781 }
 0x2a8   : > { %v773_v41 = vsel %vm772_vm8, %v769_v2, %v771_v38  ;;  %v774_v42 = vsel %vm772_vm8, %v771_v38, %v769_v2  ;;  %v786_v50 = vsel %vm785_vm9, %v782_v39, %v784_v17  ;;  %v787_v51 = vsel %vm785_vm9, %v784_v17, %v782_v39 }
 0x2a9   : > { %v775_v43 = vadd.f32 %v774_v42, %v762_v36  ;;  %v776_v44 = vadd.f32 %v773_v41, %v763_v37  ;;  %v845_v47 = vpop.permute.xlu2 %844  ;;  %vm969_vm8 = vcmp.lt.s32.totalorder %v1432_v1, 98  ;;  %vm982_vm9 = vcmp.lt.s32.totalorder %v1432_v1, 97 }
 0x2ab   : > { %v788_v55 = vadd.f32 %v787_v51, %v775_v43  ;;  %v789_v56 = vadd.f32 %v786_v50, %v776_v44 }
 0x2af   : > { %v795_v45 = vpop.permute.xlu0 %794  ;;  %v797_v46 = vpop.permute.xlu1 %796 }
 0x2b0   : > { %v799_v52 = vsel %vm798_vm10, %v795_v45, %v797_v46  ;;  %v800_v53 = vsel %vm798_vm10, %v797_v46, %v795_v45  ;;  %vm995_vm10 = vcmp.lt.s32.totalorder %v1432_v1, 96 }
 0x2b1   : > { %v860_v54 = vpop.permute.xlu2 %859  ;;  %v801_v59 = vadd.f32 %v800_v53, %v788_v55  ;;  %v802_v60 = vadd.f32 %v799_v52, %v789_v56 }
 0x2b7   : > { %v810_v48 = vpop.permute.xlu0 %809  ;;  %v817_v49 = vpop.permute.xlu1 %816 }
 0x2b8   : > { %v812_v57 = vsel %vm811_vm11, %v808_v29, %v810_v48  ;;  %v813_v58 = vsel %vm811_vm11, %v810_v48, %v808_v29  ;;  %v821_v3 = vsel %vm820_vm12, %v817_v49, %v819_v40  ;;  %v822_v4 = vsel %vm820_vm12, %v819_v40, %v817_v49 }
 0x2b9   : > { %v814_v63 = vadd.f32 %v813_v58, %v801_v59  ;;  %v815_v2 = vadd.f32 %v812_v57, %v802_v60  ;;  %v890_v9 = vpop.permute.xlu2 %889  ;;  %vm1008_vm11 = vcmp.lt.s32.totalorder %v1432_v1, 95  ;;  %vm1017_vm12 = vcmp.lt.s32.totalorder %v1432_v1, 94 }
 0x2bb   : > { %v823_v7 = vadd.f32 %v822_v4, %v814_v63  ;;  %v824_v8 = vadd.f32 %v821_v3, %v815_v2 }
 0x2bf   : > { %v834_v61 = vpop.permute.xlu1 %833  ;;  %v832_v62 = vpop.permute.xlu0 %831 }
 0x2c0   : > { %v836_v5 = vsel %vm835_vm13, %v832_v62, %v834_v61  ;;  %v837_v6 = vsel %vm835_vm13, %v834_v61, %v832_v62  ;;  %vm1038_vm13 = vcmp.lt.s32.totalorder %v716_v0, 256 }
 0x2c1   : > { %v838_v10 = vadd.f32 %v837_v6, %v823_v7  ;;  %v839_v11 = vadd.f32 %v836_v5, %v824_v8  ;;  %v905_v28 = vpop.permute.xlu2 %904 }
 0x2c7   : > { %v858_v12 = vpop.permute.xlu1 %857  ;;  %v847_v13 = vpop.permute.xlu0 %846 }
 0x2c8   : > { %v849_v14 = vsel %vm848_vm14, %v845_v47, %v847_v13  ;;  %v850_v15 = vsel %vm848_vm14, %v847_v13, %v845_v47  ;;  %v862_v18 = vsel %vm861_vm15, %v858_v12, %v860_v54  ;;  %v863_v19 = vsel %vm861_vm15, %v860_v54, %v858_v12 }
 0x2c9   : > { %v851_v16 = vadd.f32 %v850_v15, %v838_v10  ;;  %v852_v17 = vadd.f32 %v849_v14, %v839_v11  ;;  %v927_v33 = vpop.permute.xlu2 %926 }
 0x2cb   : > { %v864_v20 = vadd.f32 %v863_v19, %v851_v16  ;;  %v865_v21 = vadd.f32 %v862_v18, %v852_v17 }
 0x2cd   : > { %v870_v24 = vadd.f32 %v866_v22, %v864_v20  ;;  %v871_v25 = vadd.f32 %v867_v23, %v865_v21 }
 0x2cf   : > { %v879_v26 = vpop.permute.xlu1 %878  ;;  %v877_v27 = vpop.permute.xlu0 %876 }
 0x2d0   : > { %v882_v39 = vsel %vm880_vm1, %v879_v26, %v877_v27  ;;  %v881_v41 = vsel %vm880_vm1, %v877_v27, %v879_v26 }
 0x2d1   : > { %v942_v36 = vpop.permute.xlu2 %941  ;;  %v884_v43 = vadd.f32 %v882_v39, %v871_v25  ;;  %v883_v45 = vadd.f32 %v881_v41, %v870_v24 }
 0x2d7   : > { %v903_v29 = vpop.permute.xlu1 %902  ;;  %v892_v30 = vpop.permute.xlu0 %891 }
 0x2d8   : > { %v895_v42 = vsel %vm893_vm2, %v892_v30, %v890_v9  ;;  %v894_v44 = vsel %vm893_vm2, %v890_v9, %v892_v30  ;;  %v908_v48 = vsel %vm906_vm3, %v905_v28, %v903_v29  ;;  %v907_v54 = vsel %vm906_vm3, %v903_v29, %v905_v28 }
 0x2d9   : > { %v966_v31 = vpop.permute.xlu2 %965  ;;  %v897_v46 = vadd.f32 %v895_v42, %v884_v43  ;;  %v896_v47 = vadd.f32 %v894_v44, %v883_v45 }
 0x2db   : > { %v910_v51 = vadd.f32 %v908_v48, %v897_v46  ;;  %v909_v57 = vadd.f32 %v907_v54, %v896_v47 }
 0x2df   : > { %v914_v34 = vpop.permute.xlu1 %913  ;;  %v912_v35 = vpop.permute.xlu0 %911 }
 0x2e0   : > { %v917_v49 = vsel %vm915_vm4, %v914_v34, %v912_v35  ;;  %v916_v55 = vsel %vm915_vm4, %v912_v35, %v914_v34 }
 0x2e1   : > { %v981_v52 = vpop.permute.xlu2 %980  ;;  %v919_v58 = vadd.f32 %v917_v49, %v910_v51  ;;  %v918_v60 = vadd.f32 %v916_v55, %v909_v57 }
 0x2e7   : > { %v929_v37 = vpop.permute.xlu0 %928  ;;  %v940_v38 = vpop.permute.xlu1 %939 }
 0x2e8   : > { %v932_v56 = vsel %vm930_vm5, %v929_v37, %v927_v33  ;;  %v931_v59 = vsel %vm930_vm5, %v927_v33, %v929_v37  ;;  %v945_v63 = vsel %vm943_vm6, %v942_v36, %v940_v38  ;;  %v944_v5 = vsel %vm943_vm6, %v940_v38, %v942_v36 }
 0x2e9   : > { %v934_v61 = vadd.f32 %v932_v56, %v919_v58  ;;  %v933_v62 = vadd.f32 %v931_v59, %v918_v60  ;;  %v1005_v9 = vpop.permute.xlu2 %1004 }
 0x2eb   : > { %v947_v4 = vadd.f32 %v945_v63, %v934_v61  ;;  %v946_v8 = vadd.f32 %v944_v5, %v933_v62 }
 0x2ef   : > { %v953_v32 = vpop.permute.xlu0 %952  ;;  %v955_v40 = vpop.permute.xlu1 %954 }
 0x2f0   : > { %v958_v2 = vsel %vm956_vm7, %v955_v40, %v953_v32  ;;  %v957_v6 = vsel %vm956_vm7, %v953_v32, %v955_v40 }
 0x2f1   : > { %v960_v10 = vadd.f32 %v958_v2, %v947_v4  ;;  %v959_v13 = vadd.f32 %v957_v6, %v946_v8  ;;  %v1016_v25 = vpop.permute.xlu2 %1015 }
 0x2f7   : > { %v968_v50 = vpop.permute.xlu0 %967  ;;  %v979_v53 = vpop.permute.xlu1 %978 }
 0x2f8   : > { %v971_v7 = vsel %vm969_vm8, %v968_v50, %v966_v31  ;;  %v970_v12 = vsel %vm969_vm8, %v966_v31, %v968_v50  ;;  %v984_v16 = vsel %vm982_vm9, %v981_v52, %v979_v53  ;;  %v983_v20 = vsel %vm982_vm9, %v979_v53, %v981_v52 }
 0x2f9   : > { %v973_v14 = vadd.f32 %v971_v7, %v960_v10  ;;  %v972_v15 = vadd.f32 %v970_v12, %v959_v13 }
 0x2fb   : > { %v986_v19 = vadd.f32 %v984_v16, %v973_v14  ;;  %v985_v23 = vadd.f32 %v983_v20, %v972_v15 }
 0x2ff   : > { %v992_v3 = vpop.permute.xlu0 %991  ;;  %v994_v11 = vpop.permute.xlu1 %993 }
 0x300   : > { %v997_v17 = vsel %vm995_vm10, %v994_v11, %v992_v3  ;;  %v996_v21 = vsel %vm995_vm10, %v992_v3, %v994_v11 }
 0x301   : > { %v999_v24 = vadd.f32 %v997_v17, %v986_v19  ;;  %v998_v28 = vadd.f32 %v996_v21, %v985_v23 }
 0x307   : > { %v1007_v18 = vpop.permute.xlu0 %1006  ;;  %v1014_v26 = vpop.permute.xlu1 %1013 }
 0x308   : > { %v1010_v22 = vsel %vm1008_vm11, %v1007_v18, %v1005_v9  ;;  %v1009_v27 = vsel %vm1008_vm11, %v1005_v9, %v1007_v18  ;;  %v1019_v30 = vsel %vm1017_vm12, %v1016_v25, %v1014_v26  ;;  %v1018_v34 = vsel %vm1017_vm12, %v1014_v26, %v1016_v25 }
 0x309   : > { %v1012_v29 = vadd.f32 %v1010_v22, %v999_v24  ;;  %v1011_v33 = vadd.f32 %v1009_v27, %v998_v28 }
 0x30b   : > { %v1021_v36 = vadd.f32 %v1019_v30, %v1012_v29  ;;  %v1020_v38 = vadd.f32 %v1018_v34, %v1011_v33 }
 0x30f   : > { %v1026_v35 = vpop.permute.xlu0 %1025 }
 0x310   : > { %v1028_v37 = vperm.slane %v1026_v35, 0 }
 0x312   : > { %v1030_v31 = vadd.f32 %v1028_v37, %v1021_v36  ;;  %v1029_v1 = vadd.f32 %v1028_v37, %v1020_v38 }
 0x314   : > { %v1033_v39 = vrot.slane %v1030_v31, 7 }
 0x316   : > { %v1034_v32 = vsel %vm409_vm0, %v1029_v1, %v1033_v39 }
 0x317   : > { %1040 = vst.msk [vmem:[%s305_s27] sm:$0x3] %vm1038_vm13, %v1034_v32 }
 0x318 PF: > { %s20_s29 = sadd.s32 1, %s1180_s29  }
 0x319   : > { %p17_p4 = scmp.ge.s32.totalorder %s20_s29, 4  }
 0x31b   :  { %19 = sbr.rel (!%p17_p4) target bundleno = 3 (0x3), region = 82 }

</bundles_post_ra>
